<compile_context>
chip_gen: v5e
topology: v5e:2x2
jax: 0.10.0
libtpu: 0.0.40
codegen_flags: <defaults>
</compile_context>

<pallas_src>
import jax
import jax.numpy as jnp
from jax.experimental import pallas as pl
from jax.experimental.pallas import tpu as pltpu


def _round_up(n, m):
    return ((n + m - 1) // m) * m


def reward_mlp_kernel(x_ref, w1_ref, b1_ref, w2_ref, b2_ref, w3_ref, b3_ref,
                      o_ref):
    """Fused MLP forward for one (TB, D) batch tile -> (1, TB) lane-dense row."""
    x = x_ref[...]                                                # (TB, D)
    h1 = jnp.dot(x, w1_ref[...], preferred_element_type=jnp.float32)
    h1 = jnp.maximum(h1 + b1_ref[...], 0.0)                       # (TB, 64)
    h2 = jnp.dot(h1, w2_ref[...], preferred_element_type=jnp.float32)
    h2 = jnp.maximum(h2 + b2_ref[...], 0.0)                       # (TB, 32)
    # Final projection: (1, 32) @ (32, TB) -> (1, TB).  Result lanes are fully
    # dense (unmasked vst), unlike a (TB, 1) column which masks 127/128 lanes.
    o = jnp.dot(w3_ref[...], h2.T, preferred_element_type=jnp.float32)
    o_ref[...] = o + b3_ref[0, 0]                                 # scalar bias (SMEM)


def reward_model_forward(x, params):
    """x: (B, input_dim) float32 -> (B,) float32 (matches .squeeze(-1))."""
    w1, b1, w2, b2, w3, b3 = params
    B, D = x.shape

    # Batch tile: multiple of 128 (lane-dense output), >= one tile, capped at
    # 512 rows and capped so 2 * TB * D * 4 bytes (double-buffered x stream)
    # stays ~<= 8 MiB — safe under v7x's smaller scoped VMEM.
    tb_cap = max(128, ((8 << 20) // (2 * 4 * D)) // 128 * 128)
    TB = min(512, tb_cap, _round_up(B, 128))
    B_pad = _round_up(B, TB)
    if B_pad != B:
        x = jnp.pad(x, ((0, B_pad - B), (0, 0)))   # zero rows, sliced off below

    num_tiles = B_pad // TB
    flops = 2 * B_pad * (D * 64 + 64 * 32 + 32)
    bytes_accessed = 4 * (B_pad * D + B_pad + D * 64 + 64 + 64 * 32 + 32 + 32 + 1)

    out = pl.pallas_call(
        reward_mlp_kernel,
        out_shape=jax.ShapeDtypeStruct((1, B_pad), jnp.float32),
        grid=(num_tiles,),
        in_specs=[
            pl.BlockSpec((TB, D), lambda i: (i, 0)),      # x: tiled over batch
            pl.BlockSpec((D, 64), lambda i: (0, 0)),      # w1 (resident)
            pl.BlockSpec((1, 64), lambda i: (0, 0)),      # b1
            pl.BlockSpec((64, 32), lambda i: (0, 0)),     # w2
            pl.BlockSpec((1, 32), lambda i: (0, 0)),      # b2
            pl.BlockSpec((1, 32), lambda i: (0, 0)),      # w3 row (out, in)
            pl.BlockSpec(memory_space=pltpu.MemorySpace.SMEM),  # b3 scalar
        ],
        out_specs=pl.BlockSpec((1, TB), lambda i: (0, i)),
        compiler_params=pltpu.CompilerParams(
            dimension_semantics=("parallel",)),
        cost_estimate=pl.CostEstimate(
            flops=flops, transcendentals=0, bytes_accessed=bytes_accessed),
    )(x, w1, b1, w2, b2, w3, b3)

    return out[0, :B]


def init_params(input_dim, key):
    """Deterministic init mirroring nn.Linear default U[-1/sqrt(fan_in), +...].

    w1, w2 are stored pre-transposed as (in_features, out_features); the final
    layer is stored as a (1, 32) row (PyTorch (out, in) layout) plus a (1, 1)
    scalar bias that the kernel reads from SMEM.
    """
    params = []
    for fan_in, fan_out in [(input_dim, 64), (64, 32)]:
        key, kw, kb = jax.random.split(key, 3)
        bound = 1.0 / jnp.sqrt(float(fan_in))
        w = jax.random.uniform(kw, (fan_in, fan_out), jnp.float32,
                               minval=-bound, maxval=bound)
        b = jax.random.uniform(kb, (1, fan_out), jnp.float32,
                               minval=-bound, maxval=bound)
        params.extend([w, b])
    key, kw, kb = jax.random.split(key, 3)
    bound = 1.0 / jnp.sqrt(32.0)
    w3 = jax.random.uniform(kw, (1, 32), jnp.float32, minval=-bound, maxval=bound)
    b3 = jax.random.uniform(kb, (1, 1), jnp.float32, minval=-bound, maxval=bound)
    params.extend([w3, b3])
    return tuple(params)


def reference_forward(x, params):
    """Pure-JAX reference for correctness checking."""
    w1, b1, w2, b2, w3, b3 = params
    h1 = jnp.maximum(x @ w1 + b1, 0.0)
    h2 = jnp.maximum(h1 @ w2 + b2, 0.0)
    return (h2 @ w3.T + b3)[:, 0]


if __name__ == "__main__":
    key = jax.random.PRNGKey(0)
    input_dim = 32
    batch = 8

    key, kx = jax.random.split(key)
    x = jax.random.normal(kx, (batch, input_dim), jnp.float32)
    params = init_params(input_dim, key)

    out = reward_model_forward(x, params)
    out = jax.block_until_ready(out)

    ref = reference_forward(x, params)
    assert out.shape == (batch,), out.shape
    assert jnp.allclose(out, ref, atol=1e-5, rtol=1e-5), (out, ref)

    print("KERNEL_OK")
</pallas_src>

<mosaic_0001>
module attributes {stable_mosaic.version = 11 : i64} {
  func.func @reward_mlp_kernel(%arg0: i32, %arg1: memref<128x32xf32, #tpu.memory_space<vmem>>, %arg2: memref<32x64xf32, #tpu.memory_space<vmem>>, %arg3: memref<1x64xf32, #tpu.memory_space<vmem>>, %arg4: memref<64x32xf32, #tpu.memory_space<vmem>>, %arg5: memref<1x32xf32, #tpu.memory_space<vmem>>, %arg6: memref<1x32xf32, #tpu.memory_space<vmem>>, %arg7: memref<1x1xf32, #tpu.memory_space<smem>>, %arg8: memref<1x128xf32, #tpu.memory_space<vmem>>) attributes {dimension_semantics = [#tpu.dimension_semantics<parallel>], iteration_bounds = array<i64: 1>, scalar_prefetch = 0 : i64, scratch_operands = 0 : i64, tpu.core_type = #tpu.core_type<tc>, window_params = [{transform_indices = @transform_0, window_bounds = array<i64: 128, 32>}, {pipeline_mode = #tpu.pipeline_mode<synchronous>, transform_indices = @transform_1, window_bounds = array<i64: 32, 64>}, {pipeline_mode = #tpu.pipeline_mode<synchronous>, transform_indices = @transform_2, window_bounds = array<i64: 1, 64>}, {pipeline_mode = #tpu.pipeline_mode<synchronous>, transform_indices = @transform_3, window_bounds = array<i64: 64, 32>}, {pipeline_mode = #tpu.pipeline_mode<synchronous>, transform_indices = @transform_4, window_bounds = array<i64: 1, 32>}, {pipeline_mode = #tpu.pipeline_mode<synchronous>, transform_indices = @transform_5, window_bounds = array<i64: 1, 32>}, {transform_indices = @transform_6, window_bounds = array<i64: 1, 1>}, {transform_indices = @transform_7, window_bounds = array<i64: 1, 128>}]} {
    %c0 = arith.constant 0 : index
    %c0_0 = arith.constant 0 : index
    %0 = vector.load %arg1[%c0, %c0_0] : memref<128x32xf32, #tpu.memory_space<vmem>>, vector<128x32xf32>
    %c0_1 = arith.constant 0 : index
    %c0_2 = arith.constant 0 : index
    %1 = vector.load %arg2[%c0_1, %c0_2] : memref<32x64xf32, #tpu.memory_space<vmem>>, vector<32x64xf32>
    %cst = arith.constant dense<0.000000e+00> : vector<128x64xf32>
    %2 = tpu.matmul %0, %1, %cst {dimension_numbers = #tpu.dot_dimension_numbers<[1], [0], [0], [1], [0, 0, 1, 1], [], []>} : vector<128x32xf32>, vector<32x64xf32>, vector<128x64xf32> -> vector<128x64xf32>
    %c0_3 = arith.constant 0 : index
    %c0_4 = arith.constant 0 : index
    %3 = vector.load %arg3[%c0_3, %c0_4] : memref<1x64xf32, #tpu.memory_space<vmem>>, vector<1x64xf32>
    %4 = vector.broadcast %3 : vector<1x64xf32> to vector<128x64xf32>
    %5 = arith.addf %2, %4 : vector<128x64xf32>
    %cst_5 = arith.constant 0.000000e+00 : f32
    %6 = vector.broadcast %cst_5 : f32 to vector<128x64xf32>
    %7 = arith.maximumf %5, %6 : vector<128x64xf32>
    %c0_6 = arith.constant 0 : index
    %c0_7 = arith.constant 0 : index
    %8 = vector.load %arg4[%c0_6, %c0_7] : memref<64x32xf32, #tpu.memory_space<vmem>>, vector<64x32xf32>
    %cst_8 = arith.constant dense<0.000000e+00> : vector<128x32xf32>
    %9 = tpu.matmul %7, %8, %cst_8 {dimension_numbers = #tpu.dot_dimension_numbers<[1], [0], [0], [1], [0, 0, 1, 1], [], []>} : vector<128x64xf32>, vector<64x32xf32>, vector<128x32xf32> -> vector<128x32xf32>
    %c0_9 = arith.constant 0 : index
    %c0_10 = arith.constant 0 : index
    %10 = vector.load %arg5[%c0_9, %c0_10] : memref<1x32xf32, #tpu.memory_space<vmem>>, vector<1x32xf32>
    %11 = vector.broadcast %10 : vector<1x32xf32> to vector<128x32xf32>
    %12 = arith.addf %9, %11 : vector<128x32xf32>
    %cst_11 = arith.constant 0.000000e+00 : f32
    %13 = vector.broadcast %cst_11 : f32 to vector<128x32xf32>
    %14 = arith.maximumf %12, %13 : vector<128x32xf32>
    %c0_12 = arith.constant 0 : index
    %c0_13 = arith.constant 0 : index
    %15 = vector.load %arg6[%c0_12, %c0_13] : memref<1x32xf32, #tpu.memory_space<vmem>>, vector<1x32xf32>
    %16 = tpu.transpose %14, [1, 0] : vector<128x32xf32> -> vector<32x128xf32>
    %cst_14 = arith.constant dense<0.000000e+00> : vector<1x128xf32>
    %17 = tpu.matmul %15, %16, %cst_14 {dimension_numbers = #tpu.dot_dimension_numbers<[1], [0], [0], [1], [0, 0, 1, 1], [], []>} : vector<1x32xf32>, vector<32x128xf32>, vector<1x128xf32> -> vector<1x128xf32>
    %c0_15 = arith.constant 0 : index
    %c0_16 = arith.constant 0 : index
    %18 = memref.load %arg7[%c0_15, %c0_16] : memref<1x1xf32, #tpu.memory_space<smem>>
    %19 = vector.broadcast %18 : f32 to vector<1x128xf32>
    %20 = arith.addf %17, %19 : vector<1x128xf32>
    %c0_17 = arith.constant 0 : index
    %c0_18 = arith.constant 0 : index
    %21 = vector.load %arg8[%c0_17, %c0_18] : memref<1x128xf32, #tpu.memory_space<vmem>>, vector<1x128xf32>
    tpu.vector_store %arg8[%c0_17, %c0_18], %20 {strides = array<i32>} : memref<1x128xf32, #tpu.memory_space<vmem>>, vector<1x128xf32>,
    return
  }
  func.func @transform_0(%arg0: i32) -> (i32, i32) {
    %c0_i32 = arith.constant 0 : i32
    %c0_i32_0 = arith.constant 0 : i32
    return %arg0, %c0_i32 : i32, i32
  }
  func.func @transform_1(%arg0: i32) -> (i32, i32) {
    %c0_i32 = arith.constant 0 : i32
    %c0_i32_0 = arith.constant 0 : i32
    %c0_i32_1 = arith.constant 0 : i32
    return %c0_i32, %c0_i32_0 : i32, i32
  }
  func.func @transform_2(%arg0: i32) -> (i32, i32) {
    %c0_i32 = arith.constant 0 : i32
    %c0_i32_0 = arith.constant 0 : i32
    %c0_i32_1 = arith.constant 0 : i32
    return %c0_i32, %c0_i32_0 : i32, i32
  }
  func.func @transform_3(%arg0: i32) -> (i32, i32) {
    %c0_i32 = arith.constant 0 : i32
    %c0_i32_0 = arith.constant 0 : i32
    %c0_i32_1 = arith.constant 0 : i32
    return %c0_i32, %c0_i32_0 : i32, i32
  }
  func.func @transform_4(%arg0: i32) -> (i32, i32) {
    %c0_i32 = arith.constant 0 : i32
    %c0_i32_0 = arith.constant 0 : i32
    %c0_i32_1 = arith.constant 0 : i32
    return %c0_i32, %c0_i32_0 : i32, i32
  }
  func.func @transform_5(%arg0: i32) -> (i32, i32) {
    %c0_i32 = arith.constant 0 : i32
    %c0_i32_0 = arith.constant 0 : i32
    %c0_i32_1 = arith.constant 0 : i32
    return %c0_i32, %c0_i32_0 : i32, i32
  }
  func.func @transform_6(%arg0: i32) -> (i32, i32) {
    %c0_i32 = arith.constant 0 : i32
    %c0_i32_0 = arith.constant 0 : i32
    %c0_i32_1 = arith.constant 0 : i32
    return %c0_i32, %c0_i32_0 : i32, i32
  }
  func.func @transform_7(%arg0: i32) -> (i32, i32) {
    %c0_i32 = arith.constant 0 : i32
    %c0_i32_0 = arith.constant 0 : i32
    return %c0_i32, %arg0 : i32, i32
  }
}

</mosaic_0001>

<bundles_post_ra>
// kernel: tpu_custom_call.1
= control target key start
LH: loop header
LB: loop body
LE: loop exit
PB: predicated region body
PF: predicated region fallthrough
CT: control target
= control target key end

     0   :  { %s712_s0 = inlined_call_operand.vmem [shape: f32[128,32], index: 0, kind: input, shape index: {}]   ;;  %s713_s1 = inlined_call_operand.vmem [shape: f32[32,64], index: 1, kind: input, shape index: {}]   ;;  %s714_s2 = inlined_call_operand.vmem [shape: f32[1,64], index: 2, kind: input, shape index: {}]   ;;  %s715_s3 = inlined_call_operand.vmem [shape: f32[64,32], index: 3, kind: input, shape index: {}]   ;;  %s716_s4 = inlined_call_operand.vmem [shape: f32[1,32], index: 4, kind: input, shape index: {}]   ;;  %s717_s5 = inlined_call_operand.vmem [shape: f32[1,32], index: 5, kind: input, shape index: {}]   ;;  %s718_s6 = inlined_call_operand.<no memory space> [shape: f32[1,1], index: 6, kind: input, shape index: {}]   ;;  %s719_s7 = inlined_call_operand.hbm [shape: f32[1,128], index: 7, kind: output, shape index: {}]  }
   0x1   :  { %v47_v0 = vld [vmem:[%s713_s1 + $0x18] sm:$0xff]  ;;  %v46_v1 = vld [vmem:[%s713_s1 + $0x10] sm:$0xff]  ;;  %v45_v2 = vld [vmem:[%s713_s1 + $0x8] sm:$0xff] }
   0x2   :  { %113 = vmatpush.msra.mxu0 %v47_v0  ;;  %464 = vmatpush.msra.mxu3 %v47_v0 }
   0x4   :  { %114 = vmatpush.msra.mxu0 %v46_v1  ;;  %465 = vmatpush.msra.mxu3 %v46_v1 }
   0x5   :  { %13 = vsyncpa [#allocation4], 0  ;;  %v44_v3 = vld [vmem:[%s713_s1] sm:$0xff]  ;;  %vm52_vm0 = vcmask 261120   ;;  %v29_v5 = vld [vmem:[%s712_s0 + $0x8] sm:$0xff]  ;;  %vm194_vm1 = vcmask 523264  }
   0x6   :  { %115 = vmatpush.msra.mxu0 %v45_v2  ;;  %v28_v4 = vld [vmem:[%s712_s0] sm:$0xff]  ;;  %466 = vmatpush.msra.mxu3 %v45_v2  ;;  %v30_v6 = vld [vmem:[%s712_s0 + $0x10] sm:$0xff]  ;;  %v31_v7 = vld [vmem:[%s712_s0 + $0x18] sm:$0xff]  ;;  %s505_s13 = smov [#allocation3]   ;;  %s406_s16 = sshll.u32 %s719_s7, 4  ;;  %s407_s16 = int_to_ptr.hbm [resolvable:$true] %s406_s16 }
   0x7   :  { %v32_v8 = vld [vmem:[%s712_s0 + $0x20] sm:$0xff]  ;;  %v33_v9 = vld [vmem:[%s712_s0 + $0x28] sm:$0xff]  ;;  %v34_v10 = vld [vmem:[%s712_s0 + $0x30] sm:$0xff]  ;;  %s404_s14 = sshll.u32 %s505_s13, 4  ;;  %s405_s14 = int_to_ptr.vmem [resolvable:$true] %s404_s14 }
   0x8   :  { %116 = vmatpush.msra.mxu0 %v44_v3  ;;  %467 = vmatpush.msra.mxu3 %v44_v3  ;;  %v39_v11 = vld [vmem:[%s712_s0 + $0x58] sm:$0xff]  ;;  %v188_v13 = vld [vmem:[%s715_s3 + $0x30] sm:$0xff]  ;;  %v187_v14 = vld [vmem:[%s715_s3 + $0x28] sm:$0xff] }
   0x9   :  { %415 = vmatmul.msk.f32.vlgmr.msra.gmra.mxu0 %vm52_vm0, %v28_v4  ;;  %426 = vmatmul.msk.f32.vlgmr.msra.gmra.mxu3 %vm52_vm0, %v39_v11  ;;  %v189_v12 = vld [vmem:[%s715_s3 + $0x38] sm:$0xff]  ;;  %v186_v16 = vld [vmem:[%s715_s3 + $0x20] sm:$0xff]  ;;  %v41_v20 = vld [vmem:[%s712_s0 + $0x68] sm:$0xff] }
   0xa   :  { %251 = vmatpush.msra.mxu1 %v189_v12  ;;  %468 = vmatpush.msrb.mxu3 %v189_v12  ;;  %v35_v15 = vld [vmem:[%s712_s0 + $0x38] sm:$0xff]  ;;  %v40_v17 = vld [vmem:[%s712_s0 + $0x60] sm:$0xff]  ;;  %v37_v21 = vld [vmem:[%s712_s0 + $0x48] sm:$0xff] }
   0xb   :  { %v185_v18 = vld [vmem:[%s715_s3 + $0x18] sm:$0xff]  ;;  %v36_v19 = vld [vmem:[%s712_s0 + $0x40] sm:$0xff]  ;;  %v42_v22 = vld [vmem:[%s712_s0 + $0x70] sm:$0xff] }
   0xc   :  { %252 = vmatpush.msra.mxu1 %v188_v13  ;;  %469 = vmatpush.msrb.mxu3 %v188_v13  ;;  %v38_v23 = vld [vmem:[%s712_s0 + $0x50] sm:$0xff]  ;;  %v43_v24 = vld [vmem:[%s712_s0 + $0x78] sm:$0xff]  ;;  %v183_v26 = vld [vmem:[%s715_s3 + $0x8] sm:$0xff] }
   0xd   :  { %v184_v25 = vld [vmem:[%s715_s3 + $0x10] sm:$0xff]  ;;  %v182_v27 = vld [vmem:[%s715_s3] sm:$0xff] }
   0xe   :  { %253 = vmatpush.msra.mxu1 %v187_v14  ;;  %470 = vmatpush.msrb.mxu3 %v187_v14  ;;  %v649_v28 = vld [vmem:[%s714_s2] ss:$0 sm:$0xff] }
  0x10   :  { %254 = vmatpush.msra.mxu1 %v186_v16  ;;  %471 = vmatpush.msrb.mxu3 %v186_v16 }
  0x11   :  { %416 = vmatmul.msk.f32.gmra.mxu0 %vm52_vm0, %v29_v5  ;;  %427 = vmatmul.msk.f32.gmra.mxu3 %vm52_vm0, %v40_v17 }
  0x12   :  { %255 = vmatpush.msra.mxu1 %v185_v18  ;;  %472 = vmatpush.msrb.mxu3 %v185_v18 }
  0x14   :  { %256 = vmatpush.msra.mxu1 %v184_v25  ;;  %473 = vmatpush.msrb.mxu3 %v184_v25  ;;  %v478_v25 = vld [vmem:[%s716_s4] ss:$0 sm:$0xff] }
  0x16   :  { %257 = vmatpush.msra.mxu1 %v183_v26  ;;  %474 = vmatpush.msrb.mxu3 %v183_v26 }
  0x18   :  { %258 = vmatpush.msra.mxu1 %v182_v27  ;;  %475 = vmatpush.msrb.mxu3 %v182_v27 }
  0x19   :  { %417 = vmatmul.msk.f32.gmra.mxu0 %vm52_vm0, %v30_v6  ;;  %428 = vmatmul.msk.f32.gmra.mxu3 %vm52_vm0, %v41_v20 }
  0x21   :  { %418 = vmatmul.msk.f32.gmra.mxu0 %vm52_vm0, %v31_v7  ;;  %429 = vmatmul.msk.f32.gmra.mxu3 %vm52_vm0, %v42_v22 }
  0x29   :  { %419 = vmatmul.msk.f32.gmra.mxu0 %vm52_vm0, %v32_v8  ;;  %430 = vmatmul.msk.f32.gmra.mxu3 %vm52_vm0, %v43_v24 }
  0x31   :  { %420 = vmatmul.msk.f32.gmra.mxu0 %vm52_vm0, %v33_v9 }
  0x39   :  { %421 = vmatmul.msk.f32.gmra.mxu0 %vm52_vm0, %v34_v10 }
  0x41   :  { %422 = vmatmul.msk.f32.gmra.mxu0 %vm52_vm0, %v35_v15 }
  0x49   :  { %423 = vmatmul.msk.f32.gmra.mxu0 %vm52_vm0, %v36_v19 }
  0x51   :  { %424 = vmatmul.msk.f32.gmra.mxu0 %vm52_vm0, %v37_v21 }
  0x59   :  { %425 = vmatmul.msk.f32.gmra.mxu0 %vm52_vm0, %v38_v23 }
  0x86   :  { %v118_v29 = vpop.f32.mrf.mxu0 }
  0x87   :  { %v119_v30 = vadd.f32 %v649_v28, %v118_v29 }
  0x89   :  { %v166_v31 = vmax.f32 %v119_v30, 0.0 }
  0x8b   :  { %431 = vmatmul.msk.f32.vlgmr.msra.gmra.mxu1 %vm194_vm1, %v166_v31 }
  0x8c   :  { %v151_v58 = vpop.f32.mrf.mxu3 }
  0x8d   :  { %v152_v0 = vadd.f32 %v649_v28, %v151_v58 }
  0x8e   :  { %v121_v32 = vpop.f32.mrf.mxu0 }
  0x8f   :  { %v122_v33 = vadd.f32 %v649_v28, %v121_v32  ;;  %v177_v1 = vmax.f32 %v152_v0, 0.0 }
  0x91   :  { %v167_v34 = vmax.f32 %v122_v33, 0.0 }
  0x93   :  { %432 = vmatmul.msk.f32.gmra.mxu1 %vm194_vm1, %v167_v34 }
  0x94   :  { %v154_v63 = vpop.f32.mrf.mxu3 }
  0x95   :  { %v155_v2 = vadd.f32 %v649_v28, %v154_v63  ;;  %v326_v63 = vstv %s718_s6 }
  0x96   :  { %v124_v35 = vpop.f32.mrf.mxu0 }
  0x97   :  { %v125_v36 = vadd.f32 %v649_v28, %v124_v35  ;;  %v178_v4 = vmax.f32 %v155_v2, 0.0 }
  0x99   :  { %v168_v37 = vmax.f32 %v125_v36, 0.0 }
  0x9b   :  { %433 = vmatmul.msk.f32.gmra.mxu1 %vm194_vm1, %v168_v37 }
  0x9c   :  { %v157_v3 = vpop.f32.mrf.mxu3 }
  0x9d   :  { %v158_v5 = vadd.f32 %v649_v28, %v157_v3 }
  0x9e   :  { %v127_v38 = vpop.f32.mrf.mxu0 }
  0x9f   :  { %v128_v39 = vadd.f32 %v649_v28, %v127_v38  ;;  %v179_v7 = vmax.f32 %v158_v5, 0.0 }
  0xa1   :  { %v169_v40 = vmax.f32 %v128_v39, 0.0 }
  0xa3   :  { %434 = vmatmul.msk.f32.gmra.mxu1 %vm194_vm1, %v169_v40 }
  0xa4   :  { %v160_v6 = vpop.f32.mrf.mxu3 }
  0xa5   :  { %v161_v8 = vadd.f32 %v649_v28, %v160_v6 }
  0xa6   :  { %v130_v41 = vpop.f32.mrf.mxu0 }
  0xa7   :  { %v131_v42 = vadd.f32 %v649_v28, %v130_v41  ;;  %v180_v9 = vmax.f32 %v161_v8, 0.0 }
  0xa9   :  { %v170_v43 = vmax.f32 %v131_v42, 0.0 }
  0xab   :  { %435 = vmatmul.msk.f32.gmra.mxu1 %vm194_vm1, %v170_v43 }
  0xac   :  { %v163_v10 = vpop.f32.mrf.mxu3 }
  0xad   :  { %v164_v11 = vadd.f32 %v649_v28, %v163_v10 }
  0xae   :  { %v133_v44 = vpop.f32.mrf.mxu0 }
  0xaf   :  { %v134_v45 = vadd.f32 %v649_v28, %v133_v44  ;;  %v181_v12 = vmax.f32 %v164_v11, 0.0 }
  0xb1   :  { %v171_v46 = vmax.f32 %v134_v45, 0.0 }
  0xb3   :  { %436 = vmatmul.msk.f32.gmra.mxu1 %vm194_vm1, %v171_v46 }
  0xb6   :  { %v136_v47 = vpop.f32.mrf.mxu0 }
  0xb7   :  { %v137_v48 = vadd.f32 %v649_v28, %v136_v47 }
  0xb9   :  { %v172_v49 = vmax.f32 %v137_v48, 0.0 }
  0xbb   :  { %437 = vmatmul.msk.f32.gmra.mxu1 %vm194_vm1, %v172_v49 }
  0xbe   :  { %v139_v50 = vpop.f32.mrf.mxu0 }
  0xbf   :  { %v140_v51 = vadd.f32 %v649_v28, %v139_v50 }
  0xc1   :  { %v173_v52 = vmax.f32 %v140_v51, 0.0 }
  0xc3   :  { %438 = vmatmul.msk.f32.gmra.mxu1 %vm194_vm1, %v173_v52 }
  0xc6   :  { %v142_v53 = vpop.f32.mrf.mxu0 }
  0xc7   :  { %v143_v54 = vadd.f32 %v649_v28, %v142_v53 }
  0xc9   :  { %v174_v55 = vmax.f32 %v143_v54, 0.0 }
  0xcb   :  { %439 = vmatmul.msk.f32.gmra.mxu1 %vm194_vm1, %v174_v55 }
  0xce   :  { %v145_v56 = vpop.f32.mrf.mxu0 }
  0xcf   :  { %v146_v57 = vadd.f32 %v649_v28, %v145_v56 }
  0xd1   :  { %v175_v59 = vmax.f32 %v146_v57, 0.0 }
  0xd3   :  { %440 = vmatmul.msk.f32.gmra.mxu1 %vm194_vm1, %v175_v59 }
  0xd6   :  { %v148_v60 = vpop.f32.mrf.mxu0 }
  0xd7   :  { %v149_v61 = vadd.f32 %v649_v28, %v148_v60 }
  0xd9   :  { %v176_v62 = vmax.f32 %v149_v61, 0.0 }
  0xdb   :  { %441 = vmatmul.msk.f32.vlgmr.msrb.gmra.mxu3 %vm194_vm1, %v176_v62  ;;  %v324_v62 = vld [vmem:[%s717_s5] sm:$0x1] }
  0xe3   :  { %442 = vmatmul.msk.f32.gmra.mxu3 %vm194_vm1, %v177_v1 }
  0xeb   :  { %443 = vmatmul.msk.f32.gmra.mxu3 %vm194_vm1, %v178_v4 }
  0xf3   :  { %444 = vmatmul.msk.f32.gmra.mxu3 %vm194_vm1, %v179_v7 }
  0xfb   :  { %445 = vmatmul.msk.f32.gmra.mxu3 %vm194_vm1, %v180_v9 }
 0x103   :  { %446 = vmatmul.msk.f32.gmra.mxu3 %vm194_vm1, %v181_v12 }
 0x108   :  { %v260_v13 = vpop.f32.mrf.mxu1 }
 0x109   :  { %v261_v59 = vadd.f32 %v478_v25, %v260_v13 }
 0x10b   :  { %v308_v61 = vmax.f32 %v261_v59, 0.0 }
 0x110   :  { %v263_v14 = vpop.f32.mrf.mxu1 }
 0x111   :  { %v264_v57 = vadd.f32 %v478_v25, %v263_v14 }
 0x113   :  { %v309_v60 = vmax.f32 %v264_v57, 0.0 }
 0x118   :  { %v266_v15 = vpop.f32.mrf.mxu1 }
 0x119   :  { %v267_v55 = vadd.f32 %v478_v25, %v266_v15 }
 0x11b   :  { %v310_v58 = vmax.f32 %v267_v55, 0.0 }
 0x120   :  { %v269_v16 = vpop.f32.mrf.mxu1 }
 0x121   :  { %v270_v53 = vadd.f32 %v478_v25, %v269_v16 }
 0x123   :  { %v311_v56 = vmax.f32 %v270_v53, 0.0 }
 0x128   :  { %v272_v19 = vpop.f32.mrf.mxu1 }
 0x129   :  { %v273_v51 = vadd.f32 %v478_v25, %v272_v19 }
 0x12b   :  { %v312_v54 = vmax.f32 %v273_v51, 0.0 }
 0x130   :  { %v275_v21 = vpop.f32.mrf.mxu1 }
 0x131   :  { %v276_v49 = vadd.f32 %v478_v25, %v275_v21 }
 0x133   :  { %v313_v52 = vmax.f32 %v276_v49, 0.0 }
 0x138   :  { %v278_v23 = vpop.f32.mrf.mxu1 }
 0x139   :  { %v279_v47 = vadd.f32 %v478_v25, %v278_v23 }
 0x13b   :  { %v314_v50 = vmax.f32 %v279_v47, 0.0 }
 0x140   :  { %v281_v26 = vpop.f32.mrf.mxu1 }
 0x141   :  { %v282_v45 = vadd.f32 %v478_v25, %v281_v26 }
 0x143   :  { %v315_v48 = vmax.f32 %v282_v45, 0.0 }
 0x148   :  { %v284_v33 = vpop.f32.mrf.mxu1 }
 0x149   :  { %v285_v43 = vadd.f32 %v478_v25, %v284_v33 }
 0x14b   :  { %v316_v46 = vmax.f32 %v285_v43, 0.0 }
 0x150   :  { %v287_v40 = vpop.f32.mrf.mxu1 }
 0x151   :  { %v288_v41 = vadd.f32 %v478_v25, %v287_v40 }
 0x153   :  { %v317_v44 = vmax.f32 %v288_v41, 0.0 }
 0x15e   :  { %v290_v17 = vpop.f32.mrf.mxu3 }
 0x15f   :  { %v291_v38 = vadd.f32 %v478_v25, %v290_v17 }
 0x161   :  { %v318_v42 = vmax.f32 %v291_v38, 0.0 }
 0x166   :  { %v293_v18 = vpop.f32.mrf.mxu3 }
 0x167   :  { %v294_v36 = vadd.f32 %v478_v25, %v293_v18 }
 0x169   :  { %v319_v39 = vmax.f32 %v294_v36, 0.0 }
 0x16e   :  { %v296_v20 = vpop.f32.mrf.mxu3 }
 0x16f   :  { %v297_v34 = vadd.f32 %v478_v25, %v296_v20 }
 0x171   :  { %v320_v37 = vmax.f32 %v297_v34, 0.0 }
 0x176   :  { %v299_v22 = vpop.f32.mrf.mxu3 }
 0x177   :  { %v300_v31 = vadd.f32 %v478_v25, %v299_v22 }
 0x179   :  { %v321_v35 = vmax.f32 %v300_v31, 0.0 }
 0x17e   :  { %v302_v24 = vpop.f32.mrf.mxu3 }
 0x17f   :  { %v303_v29 = vadd.f32 %v478_v25, %v302_v24 }
 0x181   :  { %v322_v32 = vmax.f32 %v303_v29, 0.0 }
 0x186   :  { %v305_v27 = vpop.f32.mrf.mxu3 }
 0x187   :  { %v306_v28 = vadd.f32 %v478_v25, %v305_v27 }
 0x189   :  { %v323_v30 = vmax.f32 %v306_v28, 0.0 }
 0x18b   :  { %447 = vmatpush.xpose.msk.msra.mxu2 %vm52_vm0, %v323_v30 }
 0x18f   :  { %448 = vmatpush.xpose.msk.msra.mxu2 %vm52_vm0, %v322_v32 }
 0x193   :  { %449 = vmatpush.xpose.msk.msra.mxu2 %vm52_vm0, %v321_v35 }
 0x197   :  { %450 = vmatpush.xpose.msk.msra.mxu2 %vm52_vm0, %v320_v37 }
 0x19b   :  { %451 = vmatpush.xpose.msk.msra.mxu2 %vm52_vm0, %v319_v39 }
 0x19f   :  { %452 = vmatpush.xpose.msk.msra.mxu2 %vm52_vm0, %v318_v42 }
 0x1a3   :  { %453 = vmatpush.xpose.msk.msra.mxu2 %vm52_vm0, %v317_v44 }
 0x1a7   :  { %454 = vmatpush.xpose.msk.msra.mxu2 %vm52_vm0, %v316_v46 }
 0x1ab   :  { %455 = vmatpush.xpose.msk.msra.mxu2 %vm52_vm0, %v315_v48 }
 0x1af   :  { %456 = vmatpush.xpose.msk.msra.mxu2 %vm52_vm0, %v314_v50 }
 0x1b3   :  { %457 = vmatpush.xpose.msk.msra.mxu2 %vm52_vm0, %v313_v52 }
 0x1b7   :  { %458 = vmatpush.xpose.msk.msra.mxu2 %vm52_vm0, %v312_v54 }
 0x1bb   :  { %459 = vmatpush.xpose.msk.msra.mxu2 %vm52_vm0, %v311_v56 }
 0x1bf   :  { %460 = vmatpush.xpose.msk.msra.mxu2 %vm52_vm0, %v310_v58 }
 0x1c3   :  { %461 = vmatpush.xpose.msk.msra.mxu2 %vm52_vm0, %v309_v60 }
 0x1c7   :  { %462 = vmatpush.xpose.msk.msra.mxu2 %vm52_vm0, %v308_v61 }
 0x1ca   :  { %463 = vmatmul.msk.f32.vlgmr.msra.gmra.mxu2 %vm52_vm0, %v324_v62 }
 0x24d   :  { %v395_v0 = vpop.f32.mrf.mxu2 }
 0x24e   :  { %v396_v1 = vadd.f32 %v395_v0, %v326_v63 }
 0x250   :  { %398 = vst [vmem:[#allocation3] sm:$0x1] %v396_v1 }
 0x251   :  { %409 = dma.vmem_to_hbm [thread:$0]  %s405_s14, 16, %s407_s16, [#allocation4]  }
 0x252   :  { %503 = dma.done.wait [#allocation4], 16  }
 0x253   :  { %504 = vsyncadd [#allocation4], 4294967280 }
 0x254   :  { %414 = vsyncpa [#allocation4], 1 }

</bundles_post_ra>
